<compile_context>
chip_gen: v7x
topology: tpu7x:2x2x1
jax: 0.10.0
libtpu: 0.0.40
codegen_flags: <defaults>
</compile_context>

<pallas_src>
import jax
import jax.numpy as jnp
from jax.experimental import pallas as pl
from jax.experimental.pallas import tpu as pltpu


def _block_avg_matrix(n, s):
    """Symmetric (n, n) matrix with 1/s inside s x s diagonal blocks."""
    i = jnp.arange(n)[:, None]
    j = jnp.arange(n)[None, :]
    return jnp.where((i // s) == (j // s), 1.0 / s, 0.0).astype(jnp.float32)


def _leaky(x, slope=0.2):
    # slope < 1  =>  LeakyReLU(x) == max(x, slope * x): one vmax, no cmp+select.
    return jnp.maximum(x, slope * x)


def _pyramid_pool_kernel(x_ref, w1_ref, ah_ref, aw_ref, wbp_ref, bb_ref, o_ref):
    S, V, _ = ah_ref.shape          # V = batches_per_block * H
    W = aw_ref.shape[-1]
    Cout, L = o_ref.shape           # L = batches_per_block * H * W
    row0 = w1_ref.shape[0] - Cout   # sublane-aligned offset of the feat weights

    x = x_ref[...].astype(jnp.float32)                                   # (C, L)

    # Fused channel mixing: rows [0:S] = stage 1x1 convs, rows [row0:] =
    # bottleneck feat part.  Single lane-dense MXU matmul sharing the LHS.
    zf = jnp.dot(w1_ref[...], x, preferred_element_type=jnp.float32)     # (row0+Cout, L)
    acc = zf[row0:, :]                                                   # (Cout, L)
    zs = zf[:S, :].reshape(S, V, W)                                      # (S, V, W)

    # Per-stage pool + nearest-upsample via symmetric block-average operators.
    # LeakyReLU commutes with the replication, so it is applied after A_H/A_W.
    priors = []
    for i in range(S):
        p = jnp.dot(ah_ref[i], zs[i], preferred_element_type=jnp.float32)   # (V, W)
        p = jnp.dot(p, aw_ref[i], preferred_element_type=jnp.float32)       # A_W == A_W^T
        priors.append(_leaky(p))                                            # stage LeakyReLU
    pri = jnp.stack(priors, axis=0).reshape(S, L)                        # (S, L)

    # Bottleneck prior contribution as one matmul, then bias + final LeakyReLU.
    acc = acc + jnp.dot(wbp_ref[...], pri, preferred_element_type=jnp.float32)
    acc = acc + bb_ref[...]                                              # (Cout, 1) bcast
    o_ref[...] = _leaky(acc).astype(o_ref.dtype)                         # dense (Cout, L) store


def pyramid_pooling(x_nchw, ws, wbf, wbp, bb, scales, *, io_dtype=jnp.float32):
    """Pallas implementation of PyramidPooling.forward (input/output in NCHW)."""
    N, C, H, W = x_nchw.shape
    S = len(scales)
    Cout = wbf.shape[1]
    for s in scales:
        assert H % s == 0 and W % s == 0, "spatial dims must be divisible by every scale"

    # <= 2 grid steps: whole batch split across at most two parallel blocks.
    num_blocks = 2 if (N >= 2 and N % 2 == 0) else 1
    nb = N // num_blocks
    V = nb * H                     # rows per block (batch-major, H within batch)
    L = V * W                      # lanes per block (multiple of 128 for H*W >= 128)

    # Fused channel-mixing weights, padded so the bottleneck (feat) part starts
    # on a sublane-group boundary (clean row slice inside the kernel).
    row0 = max(8, -(-S // 8) * 8)
    w1 = jnp.zeros((row0 + Cout, C), jnp.float32)
    w1 = w1.at[:S, :].set(jnp.asarray(ws, jnp.float32).T)
    w1 = w1.at[row0:, :].set(jnp.asarray(wbf, jnp.float32).T)

    # Pool+upsample operators.  Since H % s == 0, the (V, V) row operator never
    # mixes rows belonging to different batch items within a block.
    ah = jnp.stack([_block_avg_matrix(V, s) for s in scales])            # (S, V, V)
    aw = jnp.stack([_block_avg_matrix(W, s) for s in scales])            # (S, W, W)
    wbp_t = jnp.asarray(wbp, jnp.float32).T                              # (Cout, S)
    bb2 = jnp.asarray(bb, jnp.float32).reshape(Cout, 1)

    # Channel-major, spatially-flat, lane-dense layout: (C, N*H*W).
    x_cf = jnp.transpose(x_nchw, (1, 0, 2, 3)).reshape(C, N * H * W).astype(io_dtype)

    io_bytes = jnp.dtype(io_dtype).itemsize
    # Advisory cost estimate (fused conv + S stage operators + prior matmul).
    flops = (2 * (row0 + Cout) * C * N * H * W
             + 2 * num_blocks * S * (V * V * W + V * W * W)
             + 2 * Cout * S * N * H * W)
    bytes_accessed = ((C + Cout) * N * H * W * io_bytes
                      + 4 * ((row0 + Cout) * C + S * (V * V + W * W) + Cout * (S + 1)))

    # Per-block VMEM footprint (double-buffered I/O slabs + operators + live
    # f32 intermediates).  Raise the scoped-VMEM limit only when needed.
    vmem_need = (2 * (C + Cout) * L * io_bytes
                 + 4 * ((row0 + Cout) * C + S * (V * V + W * W) + Cout * (S + 1))
                 + 4 * ((row0 + 2 * Cout) * L + 2 * S * L + C * L))
    vmem_limit = None
    if vmem_need > (12 << 20):
        vmem_limit = min(int(vmem_need * 3 // 2), 64 << 20)

    out_cf = pl.pallas_call(
        _pyramid_pool_kernel,
        out_shape=jax.ShapeDtypeStruct((Cout, N * H * W), io_dtype),
        grid_spec=pltpu.PrefetchScalarGridSpec(
            num_scalar_prefetch=0,
            grid=(num_blocks,),
            in_specs=[
                pl.BlockSpec((C, L), lambda b: (0, b)),                  # feats slab
                pl.BlockSpec((row0 + Cout, C), lambda b: (0, 0)),        # fused 1x1 weights
                pl.BlockSpec((S, V, V), lambda b: (0, 0, 0)),            # row pool+upsample
                pl.BlockSpec((S, W, W), lambda b: (0, 0, 0)),            # col pool+upsample
                pl.BlockSpec((Cout, S), lambda b: (0, 0)),               # bottleneck W (priors)
                pl.BlockSpec((Cout, 1), lambda b: (0, 0)),               # bottleneck bias
            ],
            out_specs=pl.BlockSpec((Cout, L), lambda b: (0, b)),
        ),
        compiler_params=pltpu.CompilerParams(
            dimension_semantics=("parallel",),
            vmem_limit_bytes=vmem_limit),
        cost_estimate=pl.CostEstimate(flops=int(flops), transcendentals=0,
                                      bytes_accessed=int(bytes_accessed)),
    )(x_cf, w1, ah, aw, wbp_t, bb2)

    return jnp.transpose(out_cf.reshape(Cout, N, H, W), (1, 0, 2, 3))


def reference_nchw(x, ws, wbf, wbp, bb, scales):
    """Pure-JAX replica of the PyTorch forward (NCHW), for validation."""
    N, C, H, W = x.shape
    priors = []
    for i, s in enumerate(scales):
        pooled = x.reshape(N, C, H // s, s, W // s, s).mean(axis=(3, 5))   # AvgPool2d(s)
        z = jnp.einsum('nchw,c->nhw', pooled, ws[:, i])                    # 1x1 conv, no bias
        z = jnp.where(z >= 0, z, 0.2 * z)                                  # LeakyReLU(0.2)
        up = jnp.repeat(jnp.repeat(z, s, axis=1), s, axis=2)               # nearest upsample
        priors.append(up)
    pri = jnp.stack(priors, axis=1)                                        # (N, S, H, W)
    out = (jnp.einsum('nshw,so->nohw', pri, wbp)
           + jnp.einsum('nchw,co->nohw', x, wbf)
           + bb[None, :, None, None])
    return jnp.where(out >= 0, out, 0.2 * out)


if __name__ == "__main__":
    key = jax.random.PRNGKey(0)
    # Spatial size must be divisible by every scale; max(scales)=32 -> 32x32.
    N, C, H, W = 2, 4, 32, 32
    Cout = 8
    scales = (4, 8, 16, 32)
    S = len(scales)

    k = jax.random.split(key, 5)
    x = jax.random.normal(k[0], (N, C, H, W), dtype=jnp.float32)
    ws = 0.5 * jax.random.normal(k[1], (C, S), dtype=jnp.float32)        # stage 1x1 convs
    wbp = 0.5 * jax.random.normal(k[2], (S, Cout), dtype=jnp.float32)    # bottleneck W (priors)
    wbf = 0.5 * jax.random.normal(k[3], (C, Cout), dtype=jnp.float32)    # bottleneck W (feats)
    bb = 0.1 * jax.random.normal(k[4], (Cout,), dtype=jnp.float32)       # bottleneck bias

    ref = reference_nchw(x, ws, wbf, wbp, bb, scales)

    # f32 I/O path: exact match to the reference.
    out = jax.block_until_ready(pyramid_pooling(x, ws, wbf, wbp, bb, scales))
    assert out.shape == (N, Cout, H, W), out.shape
    assert jnp.allclose(out, ref, atol=1e-4, rtol=1e-4), float(jnp.max(jnp.abs(out - ref)))

    # bf16 I/O path (halves HBM bytes for x / out); f32 accumulation in-kernel
    # keeps the error at bf16-rounding level.
    out_bf16 = jax.block_until_ready(
        pyramid_pooling(x, ws, wbf, wbp, bb, scales, io_dtype=jnp.bfloat16))
    err = float(jnp.max(jnp.abs(out_bf16.astype(jnp.float32) - ref)))
    assert jnp.allclose(out_bf16.astype(jnp.float32), ref, atol=2e-1, rtol=5e-2), err

    print("KERNEL_OK")
</pallas_src>

<mosaic_0001>
module attributes {stable_mosaic.version = 11 : i64} {
  func.func @_pyramid_pool_kernel(%arg0: i32, %arg1: memref<4x1024xf32, #tpu.memory_space<vmem>>, %arg2: memref<16x4xf32, #tpu.memory_space<vmem>>, %arg3: memref<4x32x32xf32, #tpu.memory_space<vmem>>, %arg4: memref<4x32x32xf32, #tpu.memory_space<vmem>>, %arg5: memref<8x4xf32, #tpu.memory_space<vmem>>, %arg6: memref<8x1xf32, #tpu.memory_space<vmem>>, %arg7: memref<8x1024xf32, #tpu.memory_space<vmem>>) attributes {dimension_semantics = [#tpu.dimension_semantics<parallel>], iteration_bounds = array<i64: 2>, scalar_prefetch = 0 : i64, scratch_operands = 0 : i64, tpu.core_type = #tpu.core_type<tc>, window_params = [{transform_indices = @transform_0, window_bounds = array<i64: 4, 1024>}, {pipeline_mode = #tpu.pipeline_mode<synchronous>, transform_indices = @transform_1, window_bounds = array<i64: 16, 4>}, {pipeline_mode = #tpu.pipeline_mode<synchronous>, transform_indices = @transform_2, window_bounds = array<i64: 4, 32, 32>}, {pipeline_mode = #tpu.pipeline_mode<synchronous>, transform_indices = @transform_3, window_bounds = array<i64: 4, 32, 32>}, {pipeline_mode = #tpu.pipeline_mode<synchronous>, transform_indices = @transform_4, window_bounds = array<i64: 8, 4>}, {pipeline_mode = #tpu.pipeline_mode<synchronous>, transform_indices = @transform_5, window_bounds = array<i64: 8, 1>}, {transform_indices = @transform_6, window_bounds = array<i64: 8, 1024>}]} {
    %c0 = arith.constant 0 : index
    %c0_0 = arith.constant 0 : index
    %0 = vector.load %arg1[%c0, %c0_0] : memref<4x1024xf32, #tpu.memory_space<vmem>>, vector<4x1024xf32>
    %c0_1 = arith.constant 0 : index
    %c0_2 = arith.constant 0 : index
    %1 = vector.load %arg2[%c0_1, %c0_2] : memref<16x4xf32, #tpu.memory_space<vmem>>, vector<16x4xf32>
    %cst = arith.constant dense<0.000000e+00> : vector<16x1024xf32>
    %2 = tpu.matmul %1, %0, %cst {dimension_numbers = #tpu.dot_dimension_numbers<[1], [0], [0], [1], [0, 0, 1, 1], [], []>} : vector<16x4xf32>, vector<4x1024xf32>, vector<16x1024xf32> -> vector<16x1024xf32>
    %3 = vector.extract_strided_slice %2 {offsets = [8, 0], sizes = [8, 1024], strides = [1, 1]} : vector<16x1024xf32> to vector<8x1024xf32>
    %4 = vector.extract_strided_slice %2 {offsets = [0, 0], sizes = [4, 1024], strides = [1, 1]} : vector<16x1024xf32> to vector<4x1024xf32>
    %5 = vector.shape_cast %4 : vector<4x1024xf32> to vector<4x32x32xf32>
    %c0_3 = arith.constant 0 : index
    %c0_4 = arith.constant 0 : index
    %c0_5 = arith.constant 0 : index
    %6 = vector.load %arg3[%c0_3, %c0_4, %c0_5] : memref<4x32x32xf32, #tpu.memory_space<vmem>>, vector<1x32x32xf32>
    %7 = vector.shape_cast %6 : vector<1x32x32xf32> to vector<32x32xf32>
    %8 = vector.extract_strided_slice %5 {offsets = [0, 0, 0], sizes = [1, 32, 32], strides = [1, 1, 1]} : vector<4x32x32xf32> to vector<1x32x32xf32>
    %9 = vector.shape_cast %8 : vector<1x32x32xf32> to vector<32x32xf32>
    %cst_6 = arith.constant dense<0.000000e+00> : vector<32x32xf32>
    %10 = tpu.matmul %7, %9, %cst_6 {dimension_numbers = #tpu.dot_dimension_numbers<[1], [0], [0], [1], [0, 0, 1, 1], [], []>} : vector<32x32xf32>, vector<32x32xf32>, vector<32x32xf32> -> vector<32x32xf32>
    %c0_7 = arith.constant 0 : index
    %c0_8 = arith.constant 0 : index
    %c0_9 = arith.constant 0 : index
    %11 = vector.load %arg4[%c0_7, %c0_8, %c0_9] : memref<4x32x32xf32, #tpu.memory_space<vmem>>, vector<1x32x32xf32>
    %12 = vector.shape_cast %11 : vector<1x32x32xf32> to vector<32x32xf32>
    %cst_10 = arith.constant dense<0.000000e+00> : vector<32x32xf32>
    %13 = tpu.matmul %10, %12, %cst_10 {dimension_numbers = #tpu.dot_dimension_numbers<[1], [0], [0], [1], [0, 0, 1, 1], [], []>} : vector<32x32xf32>, vector<32x32xf32>, vector<32x32xf32> -> vector<32x32xf32>
    %cst_11 = arith.constant 2.000000e-01 : f32
    %14 = vector.broadcast %cst_11 : f32 to vector<32x32xf32>
    %15 = arith.mulf %14, %13 : vector<32x32xf32>
    %16 = arith.maximumf %13, %15 : vector<32x32xf32>
    %c1 = arith.constant 1 : index
    %c0_12 = arith.constant 0 : index
    %c0_13 = arith.constant 0 : index
    %17 = vector.load %arg3[%c1, %c0_12, %c0_13] : memref<4x32x32xf32, #tpu.memory_space<vmem>>, vector<1x32x32xf32>
    %18 = vector.shape_cast %17 : vector<1x32x32xf32> to vector<32x32xf32>
    %19 = vector.extract_strided_slice %5 {offsets = [1, 0, 0], sizes = [1, 32, 32], strides = [1, 1, 1]} : vector<4x32x32xf32> to vector<1x32x32xf32>
    %20 = vector.shape_cast %19 : vector<1x32x32xf32> to vector<32x32xf32>
    %cst_14 = arith.constant dense<0.000000e+00> : vector<32x32xf32>
    %21 = tpu.matmul %18, %20, %cst_14 {dimension_numbers = #tpu.dot_dimension_numbers<[1], [0], [0], [1], [0, 0, 1, 1], [], []>} : vector<32x32xf32>, vector<32x32xf32>, vector<32x32xf32> -> vector<32x32xf32>
    %c1_15 = arith.constant 1 : index
    %c0_16 = arith.constant 0 : index
    %c0_17 = arith.constant 0 : index
    %22 = vector.load %arg4[%c1_15, %c0_16, %c0_17] : memref<4x32x32xf32, #tpu.memory_space<vmem>>, vector<1x32x32xf32>
    %23 = vector.shape_cast %22 : vector<1x32x32xf32> to vector<32x32xf32>
    %cst_18 = arith.constant dense<0.000000e+00> : vector<32x32xf32>
    %24 = tpu.matmul %21, %23, %cst_18 {dimension_numbers = #tpu.dot_dimension_numbers<[1], [0], [0], [1], [0, 0, 1, 1], [], []>} : vector<32x32xf32>, vector<32x32xf32>, vector<32x32xf32> -> vector<32x32xf32>
    %cst_19 = arith.constant 2.000000e-01 : f32
    %25 = vector.broadcast %cst_19 : f32 to vector<32x32xf32>
    %26 = arith.mulf %25, %24 : vector<32x32xf32>
    %27 = arith.maximumf %24, %26 : vector<32x32xf32>
    %c2 = arith.constant 2 : index
    %c0_20 = arith.constant 0 : index
    %c0_21 = arith.constant 0 : index
    %28 = vector.load %arg3[%c2, %c0_20, %c0_21] : memref<4x32x32xf32, #tpu.memory_space<vmem>>, vector<1x32x32xf32>
    %29 = vector.shape_cast %28 : vector<1x32x32xf32> to vector<32x32xf32>
    %30 = vector.extract_strided_slice %5 {offsets = [2, 0, 0], sizes = [1, 32, 32], strides = [1, 1, 1]} : vector<4x32x32xf32> to vector<1x32x32xf32>
    %31 = vector.shape_cast %30 : vector<1x32x32xf32> to vector<32x32xf32>
    %cst_22 = arith.constant dense<0.000000e+00> : vector<32x32xf32>
    %32 = tpu.matmul %29, %31, %cst_22 {dimension_numbers = #tpu.dot_dimension_numbers<[1], [0], [0], [1], [0, 0, 1, 1], [], []>} : vector<32x32xf32>, vector<32x32xf32>, vector<32x32xf32> -> vector<32x32xf32>
    %c2_23 = arith.constant 2 : index
    %c0_24 = arith.constant 0 : index
    %c0_25 = arith.constant 0 : index
    %33 = vector.load %arg4[%c2_23, %c0_24, %c0_25] : memref<4x32x32xf32, #tpu.memory_space<vmem>>, vector<1x32x32xf32>
    %34 = vector.shape_cast %33 : vector<1x32x32xf32> to vector<32x32xf32>
    %cst_26 = arith.constant dense<0.000000e+00> : vector<32x32xf32>
    %35 = tpu.matmul %32, %34, %cst_26 {dimension_numbers = #tpu.dot_dimension_numbers<[1], [0], [0], [1], [0, 0, 1, 1], [], []>} : vector<32x32xf32>, vector<32x32xf32>, vector<32x32xf32> -> vector<32x32xf32>
    %cst_27 = arith.constant 2.000000e-01 : f32
    %36 = vector.broadcast %cst_27 : f32 to vector<32x32xf32>
    %37 = arith.mulf %36, %35 : vector<32x32xf32>
    %38 = arith.maximumf %35, %37 : vector<32x32xf32>
    %c3 = arith.constant 3 : index
    %c0_28 = arith.constant 0 : index
    %c0_29 = arith.constant 0 : index
    %39 = vector.load %arg3[%c3, %c0_28, %c0_29] : memref<4x32x32xf32, #tpu.memory_space<vmem>>, vector<1x32x32xf32>
    %40 = vector.shape_cast %39 : vector<1x32x32xf32> to vector<32x32xf32>
    %41 = vector.extract_strided_slice %5 {offsets = [3, 0, 0], sizes = [1, 32, 32], strides = [1, 1, 1]} : vector<4x32x32xf32> to vector<1x32x32xf32>
    %42 = vector.shape_cast %41 : vector<1x32x32xf32> to vector<32x32xf32>
    %cst_30 = arith.constant dense<0.000000e+00> : vector<32x32xf32>
    %43 = tpu.matmul %40, %42, %cst_30 {dimension_numbers = #tpu.dot_dimension_numbers<[1], [0], [0], [1], [0, 0, 1, 1], [], []>} : vector<32x32xf32>, vector<32x32xf32>, vector<32x32xf32> -> vector<32x32xf32>
    %c3_31 = arith.constant 3 : index
    %c0_32 = arith.constant 0 : index
    %c0_33 = arith.constant 0 : index
    %44 = vector.load %arg4[%c3_31, %c0_32, %c0_33] : memref<4x32x32xf32, #tpu.memory_space<vmem>>, vector<1x32x32xf32>
    %45 = vector.shape_cast %44 : vector<1x32x32xf32> to vector<32x32xf32>
    %cst_34 = arith.constant dense<0.000000e+00> : vector<32x32xf32>
    %46 = tpu.matmul %43, %45, %cst_34 {dimension_numbers = #tpu.dot_dimension_numbers<[1], [0], [0], [1], [0, 0, 1, 1], [], []>} : vector<32x32xf32>, vector<32x32xf32>, vector<32x32xf32> -> vector<32x32xf32>
    %cst_35 = arith.constant 2.000000e-01 : f32
    %47 = vector.broadcast %cst_35 : f32 to vector<32x32xf32>
    %48 = arith.mulf %47, %46 : vector<32x32xf32>
    %49 = arith.maximumf %46, %48 : vector<32x32xf32>
    %50 = vector.shape_cast %16 : vector<32x32xf32> to vector<1x32x32xf32>
    %51 = vector.shape_cast %27 : vector<32x32xf32> to vector<1x32x32xf32>
    %52 = vector.shape_cast %38 : vector<32x32xf32> to vector<1x32x32xf32>
    %53 = vector.shape_cast %49 : vector<32x32xf32> to vector<1x32x32xf32>
    %54 = tpu.concatenate %50, %51, %52, %53 in 0 : vector<1x32x32xf32>, vector<1x32x32xf32>, vector<1x32x32xf32>, vector<1x32x32xf32> -> vector<4x32x32xf32>
    %55 = vector.shape_cast %54 : vector<4x32x32xf32> to vector<4x1024xf32>
    %c0_36 = arith.constant 0 : index
    %c0_37 = arith.constant 0 : index
    %56 = vector.load %arg5[%c0_36, %c0_37] : memref<8x4xf32, #tpu.memory_space<vmem>>, vector<8x4xf32>
    %cst_38 = arith.constant dense<0.000000e+00> : vector<8x1024xf32>
    %57 = tpu.matmul %56, %55, %cst_38 {dimension_numbers = #tpu.dot_dimension_numbers<[1], [0], [0], [1], [0, 0, 1, 1], [], []>} : vector<8x4xf32>, vector<4x1024xf32>, vector<8x1024xf32> -> vector<8x1024xf32>
    %58 = arith.addf %3, %57 : vector<8x1024xf32>
    %c0_39 = arith.constant 0 : index
    %c0_40 = arith.constant 0 : index
    %59 = vector.load %arg6[%c0_39, %c0_40] : memref<8x1xf32, #tpu.memory_space<vmem>>, vector<8x1xf32>
    %60 = vector.broadcast %59 : vector<8x1xf32> to vector<8x1024xf32>
    %61 = arith.addf %58, %60 : vector<8x1024xf32>
    %cst_41 = arith.constant 2.000000e-01 : f32
    %62 = vector.broadcast %cst_41 : f32 to vector<8x1024xf32>
    %63 = arith.mulf %62, %61 : vector<8x1024xf32>
    %64 = arith.maximumf %61, %63 : vector<8x1024xf32>
    %c0_42 = arith.constant 0 : index
    %c0_43 = arith.constant 0 : index
    %65 = vector.load %arg7[%c0_42, %c0_43] : memref<8x1024xf32, #tpu.memory_space<vmem>>, vector<8x1024xf32>
    tpu.vector_store %arg7[%c0_42, %c0_43], %64 {strides = array<i32>} : memref<8x1024xf32, #tpu.memory_space<vmem>>, vector<8x1024xf32>,
    return
  }
  func.func @transform_0(%arg0: i32) -> (i32, i32) {
    %c0_i32 = arith.constant 0 : i32
    %c0_i32_0 = arith.constant 0 : i32
    return %c0_i32, %arg0 : i32, i32
  }
  func.func @transform_1(%arg0: i32) -> (i32, i32) {
    %c0_i32 = arith.constant 0 : i32
    %c0_i32_0 = arith.constant 0 : i32
    %c0_i32_1 = arith.constant 0 : i32
    return %c0_i32, %c0_i32_0 : i32, i32
  }
  func.func @transform_2(%arg0: i32) -> (i32, i32, i32) {
    %c0_i32 = arith.constant 0 : i32
    %c0_i32_0 = arith.constant 0 : i32
    %c0_i32_1 = arith.constant 0 : i32
    %c0_i32_2 = arith.constant 0 : i32
    return %c0_i32, %c0_i32_0, %c0_i32_1 : i32, i32, i32
  }
  func.func @transform_3(%arg0: i32) -> (i32, i32, i32) {
    %c0_i32 = arith.constant 0 : i32
    %c0_i32_0 = arith.constant 0 : i32
    %c0_i32_1 = arith.constant 0 : i32
    %c0_i32_2 = arith.constant 0 : i32
    return %c0_i32, %c0_i32_0, %c0_i32_1 : i32, i32, i32
  }
  func.func @transform_4(%arg0: i32) -> (i32, i32) {
    %c0_i32 = arith.constant 0 : i32
    %c0_i32_0 = arith.constant 0 : i32
    %c0_i32_1 = arith.constant 0 : i32
    return %c0_i32, %c0_i32_0 : i32, i32
  }
  func.func @transform_5(%arg0: i32) -> (i32, i32) {
    %c0_i32 = arith.constant 0 : i32
    %c0_i32_0 = arith.constant 0 : i32
    %c0_i32_1 = arith.constant 0 : i32
    return %c0_i32, %c0_i32_0 : i32, i32
  }
  func.func @transform_6(%arg0: i32) -> (i32, i32) {
    %c0_i32 = arith.constant 0 : i32
    %c0_i32_0 = arith.constant 0 : i32
    return %c0_i32, %arg0 : i32, i32
  }
}

</mosaic_0001>

<bundles_post_ra>
// kernel: tpu_custom_call.1
= control target key start
LH: loop header
LB: loop body
LE: loop exit
PB: predicated region body
PF: predicated region fallthrough
CT: control target
= control target key end

     0   :  { %11 = vsyncpa [#allocation3], 0  ;;  %s3908_s0 = inlined_call_operand.hbm [shape: f32[4,2048], index: 0, kind: input, shape index: {}]   ;;  %s3909_s1 = inlined_call_operand.vmem [shape: f32[16,4], index: 1, kind: input, shape index: {}]   ;;  %s3910_s2 = inlined_call_operand.hbm [shape: f32[4,32,32], index: 2, kind: input, shape index: {}]   ;;  %s3911_s3 = inlined_call_operand.hbm [shape: f32[4,32,32], index: 3, kind: input, shape index: {}]   ;;  %s3912_s4 = inlined_call_operand.vmem [shape: f32[8,4], index: 4, kind: input, shape index: {}]   ;;  %s3913_s5 = inlined_call_operand.vmem [shape: f32[8,1], index: 5, kind: input, shape index: {}]   ;;  %s3914_s6 = inlined_call_operand.hbm [shape: f32[8,2048], index: 6, kind: output, shape index: {}]  }
   0x1   :  { %13 = vsyncpa [#allocation3 + $0x1], 0 }
   0x2   :  { %14 = vsyncpa [#allocation6], 0 }
   0x3   :  { %15 = vsyncpa [#allocation4], 0 }
   0x4   :  { %17 = vsyncpa [#allocation4 + $0x1], 0  ;;  %s3315_s21 = smov 0   ;;  %s3317_s22 = smov 0  }
   0x5   :  { %s3319_s23 = smov 0   ;;  %s3321_s24 = smov 0  }
   0x6 LB: > { %s3336_s25 = sadd.s32 4294967295, %s3265_s24   ;;  %s2700_s26 = sadd.s32 4294967294, %s3265_s24   ;;  %s3265_s24 = sphi %s3321_s24, %s3934_s24   ;;  %s3261_s23 = sphi %s3319_s23, %s3933_s23   ;;  %s3257_s22 = sphi %s3317_s22, %s3932_s22   ;;  %s3253_s21 = sphi %s3315_s21, %s3931_s21  }
   0x7   : > { %p43_p0 = scmp.ne.s32.totalorder %s3257_s22, %s3253_s21  ;;  %p3915_p1 = scmp.eq.s32.totalorder %s3336_s25, 0 }
   0x8   : > { %p178_p3 = scmp.eq.s32.totalorder %s2700_s26, 1  ;;  %p2701_p5 = scmp.ge.s32.totalorder %s3265_s24, 1 }
   0x9   : > { %p3345_p4 = por %p3915_p1, %p43_p0  ;;  %p185_p7 = scmp.lt.s32.totalorder %s3265_s24, 3 }
   0xa   : > { %p3350_p6 = por %p178_p3, %p43_p0  ;;  %s3267_s30 = smov [#allocation5]  }
   0xb   : > { %s3918_s27 = scalar_select %p3345_p4, 1, 0 }
   0xc   : > { %s3919_s28 = scalar_select %p3350_p6, 1, 0 }
   0xd   : > { %p3355_p8 = pnand %p2701_p5, %p185_p7  ;;  %s200_s7 = sshll.u32 %s3267_s30, 4  ;;  %s3359_s7 = int_to_ptr.vmem [resolvable:$true] %s200_s7 }
   0xe   : > { %s3268_s9 = smov [#allocation7]   ;;  %s3109_s13 = scalar_lea.hbm %s3910_s2, 2048 }
   0xf   : > { %p3040_p9 = pneg %p3355_p8  ;;  %s213_s10 = sshll.u32 %s3268_s9, 4  ;;  %s3370_s10 = int_to_ptr.vmem [resolvable:$true] %s213_s10 }
  0x10   : > { %p3110_p12 = scmp.ne.s32.totalorder %s3910_s2, %s3109_s13  ;;  %p3116_p5 = scmp.lt.u32.totalorder %s3109_s13, %s3910_s2 }
  0x11   : > { %p3366_p11 = pnand %p3040_p9, %p3915_p1 }
  0x13   : > { %p3111_p13 = pneg %p3366_p11 }
  0x15   : > { %p3112_p0 = pnand %p3111_p13, %p3110_p12 }
  0x17   : > { %p3113_p3 = pneg %p3112_p0 }
  0x19   : > { %p3118_p7 = pnand %p3116_p5, %p3113_p3 }
  0x1b   : > { %3121 = shalt.err (!%p3118_p7)
}
  0x1c   : > { %s3122_s18 = scalar_lea.vmem %s3359_s7, 2048  ;;  %p3130_p2 = scmp.lt.s32.totalorder %s3359_s7, %s3359_s7 }
  0x1d   : > { %p3123_p9 = scmp.ne.s32.totalorder %s3359_s7, %s3122_s18  ;;  %p3131_p12 = scmp.lt.s32.totalorder %s3122_s18, %s3122_s18 }
  0x1f   : > { %p3125_p10 = pnand %p3123_p9, %p3111_p13  ;;  %p3132_p0 = por %p3131_p12, %p3130_p2 }
  0x21   : > { %p3126_p1 = pneg %p3125_p10 }
  0x23   : > { %p3133_p6 = pnand %p3132_p0, %p3126_p1 }
  0x25   : > { %3136 = shalt.err (!%p3133_p6)
}
  0x26   : > { %s3269_s19 = smov 128   ;;  %s3270_s20 = smov 8  }
  0x27   : > { %3043 = dma.hbm_to_vmem [thread:$0]  (!%p3366_p11), %s3910_s2, 2048, %s3359_s7, [#allocation6], %s3269_s19, %s3269_s19, %s3270_s20  }
  0x28   : > { %s3137_s12 = scalar_lea.hbm %s3911_s3, 2048 }
  0x29   : > { %p3138_p2 = scmp.ne.s32.totalorder %s3911_s3, %s3137_s12  ;;  %p3144_p10 = scmp.lt.u32.totalorder %s3137_s12, %s3911_s3 }
  0x2b   : > { %p3140_p1 = pnand %p3138_p2, %p3111_p13 }
  0x2d   : > { %p3141_p6 = pneg %p3140_p1 }
  0x2f   : > { %p3146_p3 = pnand %p3144_p10, %p3141_p6 }
  0x31   : > { %3149 = shalt.err (!%p3146_p3)
}
  0x32   : > { %s3150_s7 = scalar_lea.vmem %s3370_s10, 2048  ;;  %p3158_p12 = scmp.lt.s32.totalorder %s3370_s10, %s3370_s10 }
  0x33   : > { %p3151_p5 = scmp.ne.s32.totalorder %s3370_s10, %s3150_s7  ;;  %p3159_p0 = scmp.lt.s32.totalorder %s3150_s7, %s3150_s7 }
  0x35   : > { %p3153_p7 = pnand %p3151_p5, %p3111_p13  ;;  %p3160_p2 = por %p3159_p0, %p3158_p12 }
  0x37   : > { %p3154_p9 = pneg %p3153_p7 }
  0x39   : > { %p3161_p1 = pnand %p3160_p2, %p3154_p9 }
  0x3b   : > { %3164 = shalt.err (!%p3161_p1)
}
  0x3c   : > { %3046 = dma.hbm_to_vmem [thread:$0]  (!%p3366_p11), %s3911_s3, 2048, %s3370_s10, [#allocation6], %s3269_s19, %s3269_s19, %s3270_s20  }
  0x3d   : > { %s3425_s26 = sadd.s32 1, %s3265_s24   ;;  %s30_s8 = sadd.s32 1, %s3261_s23 }
  0x3e   : > { %s27_s30 = ssub.s32 %s3265_s24, %s3425_s26  ;;  %p37_p13 = scmp.ne.s32.totalorder %s3261_s23, %s3257_s22 }
  0x3f   : > { %p28_p6 = scmp.eq.s32.totalorder %s27_s30, 0  ;;  %p38_p10 = scmp.eq.s32.totalorder %s3265_s24, 0 }
  0x40   : > { %p3922_p3 = scmp.eq.s32.totalorder %s3336_s25, 1  ;;  %p3057_p7 = scmp.lt.s32.totalorder %s3265_s24, 2 }
  0x41   : > { %s3441_s11 = scalar_select %p28_p6, %s3261_s23, %s30_s8  }
  0x42   : > { %p3435_p5 = por %p3922_p3, %p37_p13  ;;  %p39_p9 = por %p38_p10, %p37_p13 }
  0x43   : > { %s233_s12 = sand.u32 1, %s3261_s23   ;;  %s2778_s10 = sshll.u32 %s3265_s24, 9 }
  0x44   : > { %s3923_s9 = scalar_select %p3435_p5, 1, 0 }
  0x45   : > { %s2705_s13 = sshll.u32 %s233_s12, 5  ;;  %s3448_s14 = scalar_lea.hbm %s3908_s0, %s2778_s10 }
  0x46   : > { %s237_s15 = scalar_lea.vmem [#allocation2], %s2705_s13  ;;  %p3452_p11 = pnand %p3057_p7, %p39_p9 }
  0x47   : > { %s245_s16 = sshll.u32 %s237_s15, 4  ;;  %s234_s17 = scalar_lea.sflag [#allocation3], %s233_s12  ;;  %s3450_s16 = int_to_ptr.vmem [resolvable:$true] %s245_s16 }
  0x48   : > { %s3165_s18 = scalar_lea.hbm %s3448_s14, 512  ;;  %p3167_p0 = pneg %p3452_p11 }
  0x49   : > { %p3166_p12 = scmp.ne.s32.totalorder %s3448_s14, %s3165_s18  ;;  %s3170_s13 = scalar_lea.hbm %s3908_s0, 1024 }
  0x4a   : > { %p3171_p13 = scmp.lt.u32.totalorder %s3448_s14, %s3908_s0  ;;  %p3172_p6 = scmp.lt.u32.totalorder %s3170_s13, %s3165_s18 }
  0x4b   : > { %p3168_p2 = pnand %p3167_p0, %p3166_p12  ;;  %p3174_p3 = scmp.lt.u32.totalorder %s3165_s18, %s3448_s14 }
  0x4c   : > { %p3173_p10 = por %p3172_p6, %p3171_p13 }
  0x4d   : > { %p3169_p1 = pneg %p3168_p2 }
  0x4e   : > { %p3175_p7 = por %p3174_p3, %p3173_p10 }
  0x50   : > { %p3176_p9 = pnand %p3175_p7, %p3169_p1 }
  0x52   : > { %3179 = shalt.err (!%p3176_p9)
}
  0x53   : > { %s3180_s12 = scalar_lea.vmem %s3450_s16, 512  ;;  %s3271_s20 = smov [#allocation2]  }
  0x54   : > { %p3181_p12 = scmp.ne.s32.totalorder %s3450_s16, %s3180_s12  ;;  %s3185_s15 = sshll.u32 %s3271_s20, 4  ;;  %s3186_s15 = int_to_ptr.vmem [resolvable:$false] %s3185_s15 }
  0x55   : > { %s3187_s8 = scalar_lea.vmem %s3186_s15, 1024  ;;  %p3188_p4 = scmp.lt.s32.totalorder %s3450_s16, %s3186_s15 }
  0x56   : > { %p3183_p2 = pnand %p3181_p12, %p3167_p0  ;;  %p3189_p13 = scmp.lt.s32.totalorder %s3187_s8, %s3180_s12 }
  0x58   : > { %p3184_p5 = pneg %p3183_p2  ;;  %p3190_p6 = por %p3189_p13, %p3188_p4 }
  0x5a   : > { %p3191_p10 = pnand %p3190_p6, %p3184_p5 }
  0x5c   : > { %3194 = shalt.err (!%p3191_p10)
}
  0x5d   : > { %3050 = dma.hbm_to_vmem [thread:$0]  (!%p3452_p11), %s3448_s14, 512, %s3450_s16, %s234_s17  }
  0x5e   : > { %254 = sbr.rel (%p3355_p8) target bundleno = 1355 (0x54b), region = 44  ;;  %s3484_s18 = sand.u32 (!%p3355_p8), 1, %s3257_s22  }
  0x5f   : > { %s2709_s30 = sshll.u32 (!%p3355_p8), %s3484_s18, 5  ;;  %s257_s13 = scalar_lea.sflag (!%p3355_p8), [#allocation3], %s3484_s18 }
  0x60   : > { %s260_s10 = scalar_lea.vmem (!%p3355_p8), [#allocation2], %s2709_s30  ;;  %p3925_p4 = scmp.ne.s32.totalorder (!%p3355_p8), %s3918_s27, 0 }
  0x65   : > { %3240 = dma.done.wait (%p3925_p4), %s257_s13, 512  }
  0x66   : > { %3242 = vsyncadd (%p3925_p4), %s257_s13, 4294966784  ;;  %p3926_p5 = scmp.eq.s32.totalorder %s3336_s25, 0 }
  0x68   : > { %3244 = dma.done.wait (%p3926_p5), [#allocation6], 4096   ;;  %p3927_p11 = pmov %p3926_p5 }
  0x69   : > { %v3272_v0 = vmov 0.0   ;;  %v299_v1 = vld [vmem:[%s260_s10] sm:$0xff]  ;;  %vm320_vm0 = vcmask 1043456   ;;  %v300_v2 = vld [vmem:[%s260_s10 + $0x8] sm:$0xff]  ;;  %v301_v5 = vld [vmem:[%s260_s10 + $0x10] sm:$0xff]  ;;  %vm313_vm1 = vcmask 31744   ;;  %v729_v30 = vlaneseq }
  0x6a   : > { %3246 = vsyncadd (%p3927_p11), [#allocation6], 4294963200  ;;  %401 = vmatprep.mubr.f32.mxu0 %v3272_v0  ;;  %478 = vmatprep.mubr.f32.mxu1 %v3272_v0  ;;  %v309_v3 = vcombine.high %v299_v1, %v299_v1  ;;  %v310_v4 = vcombine.high %v300_v2, %v300_v2  ;;  %v302_v6 = vld [vmem:[%s260_s10 + $0x18] sm:$0xff]  ;;  %v303_v7 = vld [vmem:[%s3909_s1] sm:$0xff]  ;;  %v311_v8 = vcombine.high %v301_v5, %v301_v5  ;;  %s3273_s7 = smov 32   ;;  %s3274_s17 = smov 96  }
  0x6b   : > { %v312_v9 = vcombine.high %v302_v6, %v302_v6  ;;  %v304_v10 = vld [vmem:[%s3909_s1 + $0x8] sm:$0xff]  ;;  %s3275_s19 = smov 64   ;;  %v997_v19 = vld [vmem:[#allocation5] sm:$0xff]  ;;  %vm1001_vm2 = vcmask 261120   ;;  %v1101_v22 = vld [vmem:[#allocation7 + $0x10] sm:$0xff]  ;;  %v730_v34 = vshrl.u32 %v729_v30, 7 }
  0x6c   : > { %2713 = vmatprep.subr.msk.mxu0 %vm320_vm0, %v309_v3  ;;  %2717 = vmatprep.subr.msk.mxu1 %vm320_vm0, %v310_v4  ;;  %v1099_v20 = vld [vmem:[#allocation7] sm:$0xff]  ;;  %v1100_v21 = vld [vmem:[#allocation7 + $0x8] sm:$0xff]  ;;  %v1102_v24 = vld [vmem:[#allocation7 + $0x18] sm:$0xff]  ;;  %v3276_v28 = vmov 1983009808   ;;  %vm2213_vm3 = vcmask 523264  }
  0x6d   : > { %2714 = vmatpush1.msk.msra.mxu0 %vm320_vm0, %v299_v1  ;;  %2718 = vmatpush1.msk.msra.mxu1 %vm320_vm0, %v300_v2  ;;  %v2964_v23 = vpack.c.bf16 %v1100_v21, %v1099_v20  ;;  %v2968_v25 = vpack.c.bf16 %v1102_v24, %v1101_v22  ;;  %v727_v29 = vunpack.c.l.s4 %v3276_v28  ;;  %v3277_v37 = vmov 1934713408   ;;  %s2712_s30 = sshll.u32 %s3484_s18, 6  ;;  %s2779_s10 = sshll.u32 %s3336_s25, 10 }
  0x6e   : > { %2715 = vmatmul.mubr.msk.f32.vlgmr.msra.gmra.mrb[0].mxu0 %vm313_vm1, %v303_v7  ;;  %2719 = vmatmul.mubr.msk.f32.vlgmr.msra.gmra.mrb[0].mxu1 %vm313_vm1, %v303_v7  ;;  %v760_v38 = vunpack.c.l.s4 %v3277_v37  ;;  %vm2215_vm4 = vcmask 785408   ;;  %s3849_s13 = scalar_lea.vmem [#allocation8], %s2712_s30  ;;  %s3860_s16 = scalar_lea.hbm %s3914_s6, %s2779_s10 }
  0x6f   : > { %407 = vmatprep.mubr.f32.mxu0 %v3272_v0  ;;  %2721 = vmatprep.subr.msk.mxu0 %vm320_vm0, %v311_v8  ;;  %v728_v33 = vunpack.c.0.s8 %v727_v29  ;;  %s2611_s27 = sshll.u32 %s3849_s13, 4  ;;  %s2597_s25 = scalar_lea.sflag [#allocation4], %s3484_s18  ;;  %s3862_s27 = int_to_ptr.vmem [resolvable:$true] %s2611_s27 }
  0x70   : > { %2722 = vmatpush1.msk.msra.mxu0 %vm320_vm0, %v301_v5  ;;  %484 = vmatprep.mubr.f32.mxu1 %v3272_v0  ;;  %v761_v44 = vunpack.c.0.s8 %v760_v38  ;;  %p3928_p0 = scmp.ne.s32.totalorder %s3923_s9, 0 }
  0x71   : > { %2725 = vmatprep.subr.msk.mxu1 %vm320_vm0, %v312_v9  ;;  %v3592_v40 = vsub.s32 %v728_v33, %v730_v34 }
  0x72   : > { %2716 = vmatmul.mubr.msk.f32.gmra.mrb[2].mxu0 %vm313_vm1, %v304_v10  ;;  %2720 = vmatmul.mubr.msk.f32.gmra.mrb[2].mxu1 %vm313_vm1, %v304_v10  ;;  %v3598_v53 = vsub.s32 %v761_v44, %v730_v34 }
  0x73   : > { %555 = vmatprep.mubr.f32.mxu0 %v3272_v0  ;;  %2726 = vmatpush1.msk.msra.mxu1 %vm320_vm0, %v302_v6 }
  0x74   : > { %632 = vmatprep.mubr.f32.mxu1 %v3272_v0  ;;  %2965 = vmatprep.subr.bf16.mxu1 %v2964_v23 }
  0x76   : > { %2723 = vmatmul.mubr.msk.f32.vlgmr.msra.gmra.mrb[4].mxu0 %vm313_vm1, %v303_v7  ;;  %2727 = vmatmul.mubr.msk.f32.vlgmr.msra.gmra.mrb[4].mxu1 %vm313_vm1, %v303_v7 }
  0x77   : > { %561 = vmatprep.mubr.f32.mxu0 %v3272_v0  ;;  %638 = vmatprep.mubr.f32.mxu1 %v3272_v0 }
  0x78   : > { %2967 = vmatpush3.bf16.msra.mxu1 %v2964_v23 }
  0x79   : > { %2969 = vmatprep.subr.bf16.mxu1 %v2968_v25 }
  0x7a   : > { %2724 = vmatmul.mubr.msk.f32.gmra.mrb[6].mxu0 %vm313_vm1, %v304_v10  ;;  %2728 = vmatmul.mubr.msk.f32.gmra.mrb[6].mxu1 %vm313_vm1, %v304_v10 }
  0x7b   : > { %2852 = vmatprep.mubr.msk.f32.mxu0 %vm1001_vm2, %v997_v19 }
  0x7c   : > { %2971 = vmatpush3.bf16.msra.mxu1 %v2968_v25 }
 0x141   : > { %v3526_v11 = vpop.f32.mrb[0].mxu0  ;;  %v3528_v12 = vpop.f32.mrb[0].mxu1 }
 0x142   : > { %652 = vrot.lane.b32.xlu1 %v3526_v11, %s3273_s7  ;;  %646 = vrot.lane.b32.xlu0 %v3526_v11, %s3274_s17  ;;  %v3534_v13 = vpop.f32.mrb[1].mxu0  ;;  %v3536_v14 = vpop.f32.mrb[1].mxu1 }
 0x146   : > { %669 = vrot.lane.b32.xlu1 %v3528_v12, %s3275_s19  ;;  %649 = vrot.lane.b32.xlu0 %v3526_v11, %s3275_s19 }
 0x149   : > { %v3542_v15 = vpop.f32.mrb[4].mxu0  ;;  %v3544_v16 = vpop.f32.mrb[4].mxu1 }
 0x14a   : > { %666 = vrot.lane.b32.xlu0 %v3528_v12, %s3274_s17  ;;  %656 = vrot.lane.b32.xlu1 %v3534_v13, %s3274_s17  ;;  %v3550_v17 = vpop.f32.mrb[5].mxu0  ;;  %v3552_v18 = vpop.f32.mrb[5].mxu1 }
 0x14e   : > { %672 = vrot.lane.b32.xlu0 %v3528_v12, %s3273_s7  ;;  %662 = vrot.lane.b32.xlu1 %v3534_v13, %s3273_s7 }
 0x152   : > { %659 = vrot.lane.b32.xlu0 %v3534_v13, %s3275_s19  ;;  %676 = vrot.lane.b32.xlu1 %v3536_v14, %s3274_s17 }
 0x156   : > { %679 = vrot.lane.b32.xlu0 %v3536_v14, %s3275_s19  ;;  %682 = vrot.lane.b32.xlu1 %v3536_v14, %s3273_s7 }
 0x15a   : > { %689 = vrot.lane.b32.xlu1 %v3542_v15, %s3275_s19  ;;  %686 = vrot.lane.b32.xlu0 %v3542_v15, %s3274_s17 }
 0x15e   : > { %709 = vrot.lane.b32.xlu1 %v3544_v16, %s3275_s19  ;;  %692 = vrot.lane.b32.xlu0 %v3542_v15, %s3273_s7 }
 0x162   : > { %706 = vrot.lane.b32.xlu0 %v3544_v16, %s3274_s17  ;;  %696 = vrot.lane.b32.xlu1 %v3550_v17, %s3274_s17 }
 0x166   : > { %712 = vrot.lane.b32.xlu0 %v3544_v16, %s3273_s7  ;;  %702 = vrot.lane.b32.xlu1 %v3550_v17, %s3273_s7 }
 0x16a   : > { %699 = vrot.lane.b32.xlu0 %v3550_v17, %s3275_s19  ;;  %716 = vrot.lane.b32.xlu1 %v3552_v18, %s3274_s17 }
 0x16e   : > { %719 = vrot.lane.b32.xlu0 %v3552_v18, %s3275_s19  ;;  %722 = vrot.lane.b32.xlu1 %v3552_v18, %s3273_s7 }
 0x1b4   : > { %v653_v26 = vpop.permute.xlu1 %652  ;;  %v647_v27 = vpop.permute.xlu0 %646 }
 0x1b5   : > { %v733_v41 = vcombine.low %v647_v27, %v653_v26 }
 0x1b7   : > { %v740_v48 = vrot.slane %v733_v41, %v3592_v40 }
 0x1b8   : > { %v670_v31 = vpop.permute.xlu1 %669  ;;  %v650_v32 = vpop.permute.xlu0 %649 }
 0x1b9   : > { %v725_v39 = vcombine.low %v3526_v11, %v650_v32  ;;  %v793_v49 = vcombine.low %v3528_v12, %v670_v31 }
 0x1bb   : > { %v732_v45 = vrot.slane %v725_v39, %v3592_v40  ;;  %v800_v58 = vrot.slane %v793_v49, %v3592_v40 }
 0x1bc   : > { %v667_v35 = vpop.permute.xlu0 %666  ;;  %v657_v36 = vpop.permute.xlu1 %656 }
 0x1bd   : > { %v757_v54 = vcombine.low %v732_v45, %v740_v48  ;;  %v758_v59 = vcombine.high %v732_v45, %v740_v48 }
 0x1bf   : > { %v765_v3 = vrot.slane %v757_v54, %v3598_v53  ;;  %v772_v9 = vrot.slane %v758_v59, %v3598_v53 }
 0x1c0   : > { %v673_v42 = vpop.permute.xlu0 %672  ;;  %v663_v43 = vpop.permute.xlu1 %662 }
 0x1c1   : > { %v801_v46 = vcombine.low %v667_v35, %v673_v42  ;;  %v749_v47 = vcombine.low %v657_v36, %v663_v43 }
 0x1c3   : > { %v808_v55 = vrot.slane %v801_v46, %v3592_v40  ;;  %v756_v56 = vrot.slane %v749_v47, %v3592_v40 }
 0x1c4   : > { %v660_v50 = vpop.permute.xlu0 %659  ;;  %v677_v51 = vpop.permute.xlu1 %676 }
 0x1c5   : > { %v741_v52 = vcombine.low %v3534_v13, %v660_v50  ;;  %v825_v4 = vcombine.low %v800_v58, %v808_v55  ;;  %v826_v10 = vcombine.high %v800_v58, %v808_v55 }
 0x1c7   : > { %v748_v57 = vrot.slane %v741_v52, %v3592_v40  ;;  %v833_v23 = vrot.slane %v825_v4, %v3598_v53  ;;  %v840_v26 = vrot.slane %v826_v10, %v3598_v53 }
 0x1c8   : > { %v680_v60 = vpop.permute.xlu0 %679  ;;  %v683_v61 = vpop.permute.xlu1 %682 }
 0x1c9   : > { %v773_v62 = vcombine.low %v748_v57, %v756_v56  ;;  %v774_v63 = vcombine.high %v748_v57, %v756_v56  ;;  %v809_v1 = vcombine.low %v3536_v14, %v680_v60  ;;  %v817_v2 = vcombine.low %v677_v51, %v683_v61 }
 0x1cb   : > { %v781_v5 = vrot.slane %v773_v62, %v3598_v53  ;;  %v788_v6 = vrot.slane %v774_v63, %v3598_v53  ;;  %v816_v7 = vrot.slane %v809_v1, %v3592_v40  ;;  %v824_v8 = vrot.slane %v817_v2, %v3592_v40 }
 0x1cc   : > { %v690_v11 = vpop.permute.xlu1 %689  ;;  %v687_v12 = vpop.permute.xlu0 %686 }
 0x1cd   : > { %v841_v13 = vcombine.low %v816_v7, %v824_v8  ;;  %v842_v19 = vcombine.high %v816_v7, %v824_v8  ;;  %v789_v14 = vcombine.low %v765_v3, %v781_v5  ;;  %v790_v20 = vcombine.high %v765_v3, %v781_v5 }
 0x1ce   : > { %v791_v21 = vcombine.low %v772_v9, %v788_v6  ;;  %v792_v22 = vcombine.high %v772_v9, %v788_v6  ;;  %v861_v41 = vcombine.low %v3542_v15, %v690_v11 }
 0x1cf   : > { %v849_v24 = vrot.slane %v841_v13, %v3598_v53  ;;  %v856_v25 = vrot.slane %v842_v19, %v3598_v53 }
 0x1d0   : > { %v710_v27 = vpop.permute.xlu1 %709  ;;  %v693_v28 = vpop.permute.xlu0 %692  ;;  %v868_v47 = vrot.slane %v861_v41, %v3592_v40  ;;  %v1633_v41 = vld [vmem:[#allocation5 + $0x60] sm:$0xff] }
 0x1d1   : > { %v857_v29 = vcombine.low %v833_v23, %v849_v24  ;;  %v858_v30 = vcombine.high %v833_v23, %v849_v24  ;;  %v859_v31 = vcombine.low %v840_v26, %v856_v25  ;;  %v860_v32 = vcombine.high %v840_v26, %v856_v25 }
 0x1d2   : > { %v869_v39 = vcombine.low %v687_v12, %v693_v28  ;;  %v929_v48 = vcombine.low %v3544_v16, %v710_v27  ;;  %v998_v28 = vld [vmem:[#allocation5 + $0x8] sm:$0xff] }
 0x1d3   : > { %v2956_v33 = vpack.c.bf16 %v857_v29, %v789_v14  ;;  %v3615_v34 = vpack.c.bf16 %v858_v30, %v790_v20  ;;  %v3617_v37 = vpack.c.bf16 %v859_v31, %v791_v21  ;;  %v3619_v38 = vpack.c.bf16 %v860_v32, %v792_v22  ;;  %v999_v29 = vld [vmem:[#allocation5 + $0x10] sm:$0xff]  ;;  %v1000_v30 = vld [vmem:[#allocation5 + $0x18] sm:$0xff]  ;;  %v1209_v31 = vld [vmem:[#allocation5 + $0x20] sm:$0xff] }
 0x1d4   : > { %v707_v35 = vpop.permute.xlu0 %706  ;;  %v697_v36 = vpop.permute.xlu1 %696  ;;  %v876_v44 = vrot.slane %v869_v39, %v3592_v40  ;;  %v936_v56 = vrot.slane %v929_v48, %v3592_v40  ;;  %v1210_v32 = vld [vmem:[#allocation5 + $0x28] sm:$0xff]  ;;  %v1423_v39 = vld [vmem:[#allocation5 + $0x50] sm:$0xff]  ;;  %v1314_v48 = vld [vmem:[#allocation7 + $0x38] sm:$0xff] }
 0x1d5   : > { %2957 = vmatprep.subr.bf16.mxu0 %v2956_v33 }
 0x1d6   : > { %2959 = vmatpush3.bf16.msra.mxu0 %v2956_v33  ;;  %v893_v52 = vcombine.low %v868_v47, %v876_v44  ;;  %v894_v57 = vcombine.high %v868_v47, %v876_v44  ;;  %v1211_v33 = vld [vmem:[#allocation5 + $0x30] sm:$0xff]  ;;  %v1636_v44 = vld [vmem:[#allocation5 + $0x78] sm:$0xff] }
 0x1d7   : > { %v1313_v47 = vld [vmem:[#allocation7 + $0x30] sm:$0xff] }
 0x1d8   : > { %v713_v42 = vpop.permute.xlu0 %712  ;;  %v703_v43 = vpop.permute.xlu1 %702  ;;  %v901_v63 = vrot.slane %v893_v52, %v3598_v53  ;;  %v908_v6 = vrot.slane %v894_v57, %v3598_v53  ;;  %v1523_v52 = vld [vmem:[#allocation7 + $0x40] sm:$0xff]  ;;  %v1525_v57 = vld [vmem:[#allocation7 + $0x50] sm:$0xff] }
 0x1d9   : > { %v937_v45 = vcombine.low %v707_v35, %v713_v42  ;;  %v885_v46 = vcombine.low %v697_v36, %v703_v43  ;;  %v1421_v35 = vld [vmem:[#allocation5 + $0x40] sm:$0xff]  ;;  %v1422_v36 = vld [vmem:[#allocation5 + $0x48] sm:$0xff]  ;;  %v1635_v43 = vld [vmem:[#allocation5 + $0x70] sm:$0xff] }
 0x1da   : > { %v1634_v42 = vld [vmem:[#allocation5 + $0x68] sm:$0xff] }
 0x1db   : > { %v944_v54 = vrot.slane %v937_v45, %v3592_v40  ;;  %v892_v55 = vrot.slane %v885_v46, %v3592_v40  ;;  %v1312_v45 = vld [vmem:[#allocation7 + $0x28] sm:$0xff] }
 0x1dc   : > { %v700_v49 = vpop.permute.xlu0 %699  ;;  %v717_v50 = vpop.permute.xlu1 %716 }
 0x1dd   : > { %v877_v51 = vcombine.low %v3550_v17, %v700_v49  ;;  %v961_v17 = vcombine.low %v936_v56, %v944_v54  ;;  %v962_v1 = vcombine.high %v936_v56, %v944_v54  ;;  %v1524_v54 = vld [vmem:[#allocation7 + $0x48] sm:$0xff] }
 0x1de   : > { %v2996_v56 = vpack.c.bf16 %v1524_v54, %v1523_v52 }
 0x1df   : > { %v884_v15 = vrot.slane %v877_v51, %v3592_v40  ;;  %v969_v12 = vrot.slane %v961_v17, %v3598_v53  ;;  %v976_v13 = vrot.slane %v962_v1, %v3598_v53  ;;  %v2984_v51 = vpack.c.bf16 %v1314_v48, %v1313_v47 }
 0x1e0   : > { %v720_v58 = vpop.permute.xlu0 %719  ;;  %v723_v59 = vpop.permute.xlu1 %722 }
 0x1e1   : > { %v909_v60 = vcombine.low %v884_v15, %v892_v55  ;;  %v910_v61 = vcombine.high %v884_v15, %v892_v55  ;;  %v945_v16 = vcombine.low %v3552_v18, %v720_v58  ;;  %v953_v62 = vcombine.low %v717_v50, %v723_v59  ;;  %v1526_v58 = vld [vmem:[#allocation7 + $0x58] sm:$0xff] }
 0x1e3   : > { %v917_v2 = vrot.slane %v909_v60, %v3598_v53  ;;  %v924_v3 = vrot.slane %v910_v61, %v3598_v53  ;;  %v952_v4 = vrot.slane %v945_v16, %v3592_v40  ;;  %v960_v5 = vrot.slane %v953_v62, %v3592_v40  ;;  %v1735_v16 = vld [vmem:[#allocation7 + $0x60] sm:$0xff]  ;;  %v1736_v62 = vld [vmem:[#allocation7 + $0x68] sm:$0xff] }
 0x1e4   : > { %v3000_v61 = vpack.c.bf16 %v1526_v58, %v1525_v57  ;;  %v3012_v1 = vpack.c.bf16 %v1736_v62, %v1735_v16 }
 0x1e5   : > { %v977_v7 = vcombine.low %v952_v4, %v960_v5  ;;  %v978_v8 = vcombine.high %v952_v4, %v960_v5  ;;  %v925_v9 = vcombine.low %v901_v63, %v917_v2  ;;  %v926_v10 = vcombine.high %v901_v63, %v917_v2  ;;  %v1737_v2 = vld [vmem:[#allocation7 + $0x70] sm:$0xff] }
 0x1e6   : > { %v927_v18 = vcombine.low %v908_v6, %v924_v3  ;;  %v928_v11 = vcombine.high %v908_v6, %v924_v3  ;;  %v1738_v3 = vld [vmem:[#allocation7 + $0x78] sm:$0xff] }
 0x1e7   : > { %v985_v19 = vrot.slane %v977_v7, %v3598_v53  ;;  %v992_v14 = vrot.slane %v978_v8, %v3598_v53  ;;  %v3016_v6 = vpack.c.bf16 %v1738_v3, %v1737_v2 }
 0x1e9   : > { %v993_v20 = vcombine.low %v969_v12, %v985_v19  ;;  %v994_v21 = vcombine.high %v969_v12, %v985_v19  ;;  %v995_v22 = vcombine.low %v976_v13, %v992_v14  ;;  %v996_v23 = vcombine.high %v976_v13, %v992_v14 }
 0x1eb   : > { %v2960_v24 = vpack.c.bf16 %v993_v20, %v925_v9  ;;  %v2976_v25 = vpack.c.bf16 %v994_v21, %v926_v10  ;;  %v2992_v26 = vpack.c.bf16 %v995_v22, %v927_v18  ;;  %v3008_v27 = vpack.c.bf16 %v996_v23, %v928_v11 }
 0x1ed   : > { %2961 = vmatprep.subr.bf16.mxu0 %v2960_v24 }
 0x1ee   : > { %2963 = vmatpush3.bf16.msra.mxu0 %v2960_v24 }
 0x1ef   : > { %2973 = vmatprep.subr.bf16.mxu0 %v3615_v34 }
 0x1f1   : > { %2853 = vmatmul.mubr.msk.f32.vlgmr.msra.gmra.mrb[8].mxu0 %vm1001_vm2, %v998_v28 }
 0x1f2   : > { %2975 = vmatpush3.bf16.msra.mxu0 %v3615_v34  ;;  %2855 = vmatprep.mubr.msk.f32.mxu0 %vm1001_vm2, %v999_v29  ;;  %v1212_v34 = vld [vmem:[#allocation5 + $0x38] sm:$0xff] }
 0x1f3   : > { %2977 = vmatprep.subr.bf16.mxu0 %v2976_v25 }
 0x1f5   : > { %2856 = vmatmul.mubr.msk.f32.gmra.mrb[10].mxu0 %vm1001_vm2, %v1000_v30 }
 0x1f6   : > { %2979 = vmatpush3.bf16.msra.mxu0 %v2976_v25  ;;  %2880 = vmatprep.mubr.msk.f32.mxu0 %vm1001_vm2, %v1209_v31 }
 0x1f7   : > { %2989 = vmatprep.subr.bf16.mxu0 %v3617_v37 }
 0x1f9   : > { %2881 = vmatmul.mubr.msk.f32.vlgmr.msra.gmra.mrb[12].mxu0 %vm1001_vm2, %v1210_v32 }
 0x1fa   : > { %2991 = vmatpush3.bf16.msra.mxu0 %v3617_v37  ;;  %2883 = vmatprep.mubr.msk.f32.mxu0 %vm1001_vm2, %v1211_v33  ;;  %v1424_v37 = vld [vmem:[#allocation5 + $0x58] sm:$0xff] }
 0x1fb   : > { %2993 = vmatprep.subr.bf16.mxu0 %v2992_v26 }
 0x1fd   : > { %2884 = vmatmul.mubr.msk.f32.gmra.mrb[14].mxu0 %vm1001_vm2, %v1212_v34 }
 0x1fe   : > { %2995 = vmatpush3.bf16.msra.mxu0 %v2992_v26  ;;  %2908 = vmatprep.mubr.msk.f32.mxu0 %vm1001_vm2, %v1421_v35 }
 0x1ff   : > { %3005 = vmatprep.subr.bf16.mxu0 %v3619_v38 }
 0x201   : > { %2909 = vmatmul.mubr.msk.f32.vlgmr.msra.gmra.mrb[16].mxu0 %vm1001_vm2, %v1422_v36 }
 0x202   : > { %3007 = vmatpush3.bf16.msra.mxu0 %v3619_v38  ;;  %2911 = vmatprep.mubr.msk.f32.mxu0 %vm1001_vm2, %v1423_v39  ;;  %v1311_v38 = vld [vmem:[#allocation7 + $0x20] sm:$0xff] }
 0x203   : > { %3009 = vmatprep.subr.bf16.mxu0 %v3008_v27  ;;  %v2980_v46 = vpack.c.bf16 %v1312_v45, %v1311_v38 }
 0x205   : > { %2912 = vmatmul.mubr.msk.f32.gmra.mrb[18].mxu0 %vm1001_vm2, %v1424_v37  ;;  %2981 = vmatprep.subr.bf16.mxu1 %v2980_v46 }
 0x206   : > { %3011 = vmatpush3.bf16.msra.mxu0 %v3008_v27  ;;  %2936 = vmatprep.mubr.msk.f32.mxu0 %vm1001_vm2, %v1633_v41 }
 0x209   : > { %2937 = vmatmul.mubr.msk.f32.vlgmr.msra.gmra.mrb[20].mxu0 %vm1001_vm2, %v1634_v42 }
 0x20a   : > { %2939 = vmatprep.mubr.msk.f32.mxu0 %vm1001_vm2, %v1635_v43 }
 0x20d   : > { %2940 = vmatmul.mubr.msk.f32.gmra.mrb[22].mxu0 %vm1001_vm2, %v1636_v44 }
 0x20e   : > { %2330 = vmatprep.mubr.f32.mxu0 %v3272_v0 }
 0x2c4   : > { %v2854_v49 = vpop.f32.mrb[8].mxu0 }
 0x2c5   : > { %v1080_v50 = vpop.f32.mrb[9].mxu0 }
 0x2c6   : > { %2866 = vmatprep.mubr.msk.f32.mxu1 %vm1001_vm2, %v1080_v50 }
 0x2c7   : > { %2867 = vmatmul.mubr.msk.f32.vlgmr.msra.gmra.mrb[8].mxu1 %vm1001_vm2, %v2854_v49 }
 0x2c8   : > { %v2857_v55 = vpop.f32.mrb[10].mxu0  ;;  %2983 = vmatpush3.bf16.msra.mxu1 %v2980_v46 }
 0x2c9   : > { %v1090_v15 = vpop.f32.mrb[11].mxu0  ;;  %2985 = vmatprep.subr.bf16.mxu1 %v2984_v51 }
 0x2ca   : > { %2869 = vmatprep.mubr.msk.f32.mxu1 %vm1001_vm2, %v1090_v15 }
 0x2cb   : > { %2870 = vmatmul.mubr.msk.f32.gmra.mrb[10].mxu1 %vm1001_vm2, %v2857_v55 }
 0x2cc   : > { %v2882_v59 = vpop.f32.mrb[12].mxu0  ;;  %2987 = vmatpush3.bf16.msra.mxu1 %v2984_v51 }
 0x2cd   : > { %v1291_v60 = vpop.f32.mrb[13].mxu0  ;;  %2997 = vmatprep.subr.bf16.mxu1 %v2996_v56 }
 0x2ce   : > { %2894 = vmatprep.mubr.msk.f32.mxu1 %vm1001_vm2, %v1291_v60 }
 0x2cf   : > { %2895 = vmatmul.mubr.msk.f32.vlgmr.msra.gmra.mrb[12].mxu1 %vm1001_vm2, %v2882_v59 }
 0x2d0   : > { %v2885_v63 = vpop.f32.mrb[14].mxu0  ;;  %2999 = vmatpush3.bf16.msra.mxu1 %v2996_v56 }
 0x2d1   : > { %v1301_v17 = vpop.f32.mrb[15].mxu0  ;;  %3001 = vmatprep.subr.bf16.mxu1 %v3000_v61 }
 0x2d2   : > { %2897 = vmatprep.mubr.msk.f32.mxu1 %vm1001_vm2, %v1301_v17 }
 0x2d3   : > { %2898 = vmatmul.mubr.msk.f32.gmra.mrb[14].mxu1 %vm1001_vm2, %v2885_v63 }
 0x2d4   : > { %v2910_v4 = vpop.f32.mrb[16].mxu0  ;;  %3003 = vmatpush3.bf16.msra.mxu1 %v3000_v61 }
 0x2d5   : > { %v1503_v5 = vpop.f32.mrb[17].mxu0  ;;  %3013 = vmatprep.subr.bf16.mxu1 %v3012_v1 }
 0x2d6   : > { %2922 = vmatprep.mubr.msk.f32.mxu1 %vm1001_vm2, %v1503_v5 }
 0x2d7   : > { %2923 = vmatmul.mubr.msk.f32.vlgmr.msra.gmra.mrb[16].mxu1 %vm1001_vm2, %v2910_v4 }
 0x2d8   : > { %v2913_v7 = vpop.f32.mrb[18].mxu0  ;;  %3015 = vmatpush3.bf16.msra.mxu1 %v3012_v1 }
 0x2d9   : > { %v1513_v8 = vpop.f32.mrb[19].mxu0  ;;  %3017 = vmatprep.subr.bf16.mxu1 %v3016_v6 }
 0x2da   : > { %2925 = vmatprep.mubr.msk.f32.mxu1 %vm1001_vm2, %v1513_v8 }
 0x2db   : > { %2926 = vmatmul.mubr.msk.f32.gmra.mrb[18].mxu1 %vm1001_vm2, %v2913_v7 }
 0x2dc   : > { %v2938_v9 = vpop.f32.mrb[20].mxu0  ;;  %3019 = vmatpush3.bf16.msra.mxu1 %v3016_v6 }
 0x2dd   : > { %v1715_v10 = vpop.f32.mrb[21].mxu0 }
 0x2de   : > { %2950 = vmatprep.mubr.msk.f32.mxu1 %vm1001_vm2, %v1715_v10 }
 0x2df   : > { %2951 = vmatmul.mubr.msk.f32.vlgmr.msra.gmra.mrb[20].mxu1 %vm1001_vm2, %v2938_v9 }
 0x2e0   : > { %v2941_v18 = vpop.f32.mrb[22].mxu0 }
 0x2e1   : > { %v1725_v11 = vpop.f32.mrb[23].mxu0 }
 0x2e2   : > { %2953 = vmatprep.mubr.msk.f32.mxu1 %vm1001_vm2, %v1725_v11 }
 0x2e3   : > { %2954 = vmatmul.mubr.msk.f32.gmra.mrb[22].mxu1 %vm1001_vm2, %v2941_v18 }
 0x2e4   : > { %2401 = vmatprep.mubr.f32.mxu1 %v3272_v0 }
 0x39a   : > { %v2868_v12 = vpop.f32.mrb[8].mxu1 }
 0x39b   : > { %v1181_v13 = vpop.f32.mrb[9].mxu1  ;;  %v1201_v24 = vmul.f32 0.2, %v2868_v12 }
 0x39c   : > { %v1200_v25 = vmul.f32 0.2, %v1181_v13 }
 0x39d   : > { %v1205_v30 = vmax.f32 %v2868_v12, %v1201_v24 }
 0x39e   : > { %v2871_v19 = vpop.f32.mrb[10].mxu1  ;;  %v1204_v33 = vmax.f32 %v1181_v13, %v1200_v25 }
 0x39f   : > { %v1191_v14 = vpop.f32.mrb[11].mxu1  ;;  %v1203_v31 = vmul.f32 0.2, %v2871_v19 }
 0x3a0   : > { %v1202_v34 = vmul.f32 0.2, %v1191_v14 }
 0x3a1   : > { %v1207_v47 = vmax.f32 %v2871_v19, %v1203_v31 }
 0x3a2   : > { %v2896_v20 = vpop.f32.mrb[12].mxu1  ;;  %v1206_v51 = vmax.f32 %v1191_v14, %v1202_v34 }
 0x3a3   : > { %v1393_v21 = vpop.f32.mrb[13].mxu1  ;;  %v1413_v39 = vmul.f32 0.2, %v2896_v20 }
 0x3a4   : > { %v1412_v44 = vmul.f32 0.2, %v1393_v21 }
 0x3a5   : > { %v1417_v55 = vmax.f32 %v2896_v20, %v1413_v39 }
 0x3a6   : > { %v2899_v22 = vpop.f32.mrb[14].mxu1  ;;  %v1416_v59 = vmax.f32 %v1393_v21, %v1412_v44 }
 0x3a7   : > { %v1403_v23 = vpop.f32.mrb[15].mxu1  ;;  %v1415_v48 = vmul.f32 0.2, %v2899_v22 }
 0x3a8   : > { %v1414_v49 = vmul.f32 0.2, %v1403_v23 }
 0x3a9   : > { %v1419_v62 = vmax.f32 %v2899_v22, %v1415_v48 }
 0x3aa   : > { %v2924_v26 = vpop.f32.mrb[16].mxu1  ;;  %v1418_v63 = vmax.f32 %v1403_v23, %v1414_v49 }
 0x3ab   : > { %v1625_v27 = vmul.f32 0.2, %v2924_v26  ;;  %v1605_v28 = vpop.f32.mrb[17].mxu1 }
 0x3ac   : > { %v1624_v29 = vmul.f32 0.2, %v1605_v28 }
 0x3ad   : > { %v1629_v32 = vmax.f32 %v2924_v26, %v1625_v27 }
 0x3ae   : > { %v1628_v35 = vmax.f32 %v1605_v28, %v1624_v29  ;;  %v2927_v36 = vpop.f32.mrb[18].mxu1 }
 0x3af   : > { %v1912_v37 = vcombine.low %v1205_v30, %v1629_v32  ;;  %v1913_v41 = vcombine.high %v1205_v30, %v1629_v32  ;;  %v1627_v42 = vmul.f32 0.2, %v2927_v36  ;;  %v1615_v43 = vpop.f32.mrb[19].mxu1 }
 0x3b0   : > { %v1844_v38 = vcombine.low %v1204_v33, %v1628_v35  ;;  %v1845_v45 = vcombine.high %v1204_v33, %v1628_v35  ;;  %v1626_v46 = vmul.f32 0.2, %v1615_v43 }
 0x3b1   : > { %v1631_v50 = vmax.f32 %v2927_v36, %v1627_v42  ;;  %v1920_v17 = vrot.slane %v1912_v37, %v3592_v40  ;;  %v1927_v2 = vrot.slane %v1913_v41, %v3592_v40 }
 0x3b2   : > { %v1630_v52 = vmax.f32 %v1615_v43, %v1626_v46  ;;  %v2952_v54 = vpop.f32.mrb[20].mxu1  ;;  %v3683_v3 = vrot.slane %v1844_v38, %v3592_v40  ;;  %v1859_v4 = vrot.slane %v1845_v45, %v3592_v40 }
 0x3b3   : > { %v2048_v15 = vcombine.low %v1207_v47, %v1631_v50  ;;  %v2049_v56 = vcombine.high %v1207_v47, %v1631_v50  ;;  %v1837_v57 = vmul.f32 0.2, %v2952_v54  ;;  %v1817_v58 = vpop.f32.mrb[21].mxu1 }
 0x3b4   : > { %v1980_v60 = vcombine.low %v1206_v51, %v1630_v52  ;;  %v1981_v61 = vcombine.high %v1206_v51, %v1630_v52  ;;  %v1836_v16 = vmul.f32 0.2, %v1817_v58 }
 0x3b5   : > { %v1841_v1 = vmax.f32 %v2952_v54, %v1837_v57  ;;  %v3687_v7 = vrot.slane %v2048_v15, %v3592_v40  ;;  %v3690_v11 = vrot.slane %v2049_v56, %v3592_v40 }
 0x3b6   : > { %v1840_v5 = vmax.f32 %v1817_v58, %v1836_v16  ;;  %v2955_v6 = vpop.f32.mrb[22].mxu1  ;;  %v3693_v14 = vrot.slane %v1980_v60, %v3592_v40  ;;  %v3698_v23 = vrot.slane %v1981_v61, %v3592_v40 }
 0x3b7   : > { %v1928_v8 = vcombine.low %v1417_v55, %v1841_v1  ;;  %v1929_v9 = vcombine.high %v1417_v55, %v1841_v1  ;;  %v1839_v10 = vmul.f32 0.2, %v2955_v6  ;;  %v1827_v18 = vpop.f32.mrb[23].mxu1 }
 0x3b8   : > { %v1860_v12 = vcombine.low %v1416_v59, %v1840_v5  ;;  %v1861_v13 = vcombine.high %v1416_v59, %v1840_v5  ;;  %v1838_v19 = vmul.f32 0.2, %v1827_v18 }
 0x3b9   : > { %v1936_v20 = vrot.slane %v1928_v8, %v3592_v40  ;;  %v1943_v21 = vrot.slane %v1929_v9, %v3592_v40  ;;  %v1843_v22 = vmax.f32 %v2955_v6, %v1839_v10 }
 0x3ba   : > { %v1868_v24 = vrot.slane %v1860_v12, %v3592_v40  ;;  %v1875_v25 = vrot.slane %v1861_v13, %v3592_v40  ;;  %v1842_v26 = vmax.f32 %v1827_v18, %v1838_v19  ;;  %v3278_v13 = vmov 0  }
 0x3bb   : > { %v1944_v27 = vcombine.low %v1920_v17, %v1936_v20  ;;  %v1960_v28 = vcombine.low %v1927_v2, %v1943_v21  ;;  %v2064_v29 = vcombine.low %v1419_v62, %v1843_v22  ;;  %v2065_v30 = vcombine.high %v1419_v62, %v1843_v22  ;;  %3104 = vset.pattern.permute.xlu0 %v3278_v13 }
 0x3bc   : > { %v1876_v31 = vcombine.low %v3683_v3, %v1868_v24  ;;  %v1892_v32 = vcombine.low %v1859_v4, %v1875_v25  ;;  %v1996_v33 = vcombine.low %v1418_v63, %v1842_v26  ;;  %v1997_v34 = vcombine.high %v1418_v63, %v1842_v26 }
 0x3bd   : > { %v2072_v35 = vrot.slane %v2064_v29, %v3592_v40  ;;  %v2079_v36 = vrot.slane %v2065_v30, %v3592_v40  ;;  %v1961_v39 = vcombine.high %v1927_v2, %v1943_v21  ;;  %v1945_v37 = vcombine.high %v1920_v17, %v1936_v20  ;;  %v2558_v21 = vld [vmem:[%s3913_s5] sm:$0xff] }
 0x3be   : > { %v2004_v41 = vrot.slane %v1996_v33, %v3592_v40  ;;  %v2011_v42 = vrot.slane %v1997_v34, %v3592_v40  ;;  %v1893_v43 = vcombine.high %v1859_v4, %v1875_v25  ;;  %v1877_v44 = vcombine.high %v3683_v3, %v1868_v24 }
 0x3bf   : > { %v2080_v38 = vcombine.low %v3687_v7, %v2072_v35  ;;  %v2096_v45 = vcombine.low %v3690_v11, %v2079_v36  ;;  %v1975_v46 = vrot.slane %v1961_v39, %v3598_v53  ;;  %v1959_v47 = vrot.slane %v1945_v37, %v3598_v53  ;;  %v2238_v39 = vld [vmem:[%s3912_s4] sm:$0xff] }
 0x3c0   : > { %v2012_v48 = vcombine.low %v3693_v14, %v2004_v41  ;;  %v2028_v49 = vcombine.low %v3698_v23, %v2011_v42  ;;  %v1907_v40 = vrot.slane %v1893_v43, %v3598_v53  ;;  %v1891_v50 = vrot.slane %v1877_v44, %v3598_v53 }
 0x3c1   : > { %2157 = vrot.lane.b32.xlu1 %v1975_v46, %s3275_s19  ;;  %2145 = vrot.lane.b32.xlu0 %v1959_v47, %s3275_s19  ;;  %v3719_v51 = vrot.slane %v1960_v28, %v3598_v53  ;;  %v3722_v52 = vrot.slane %v1944_v27, %v3598_v53  ;;  %v2097_v54 = vcombine.high %v3690_v11, %v2079_v36 }
 0x3c2   : > { %v2081_v55 = vcombine.high %v3687_v7, %v2072_v35  ;;  %v2029_v15 = vcombine.high %v3698_v23, %v2011_v42  ;;  %v2013_v56 = vcombine.high %v3693_v14, %v2004_v41  ;;  %v3735_v59 = vrot.slane %v1892_v32, %v3598_v53 }
 0x3c3   : > { %v1978_v57 = vcombine.high %v3719_v51, %v3272_v0  ;;  %v1976_v58 = vcombine.high %v3722_v52, %v3272_v0  ;;  %v1979_v60 = vcombine.high %v1975_v46, %v3272_v0  ;;  %v3743_v16 = vrot.slane %v1876_v31, %v3598_v53 }
 0x3c4   : > { %v1910_v61 = vcombine.high %v3735_v59, %v3272_v0  ;;  %v1977_v62 = vcombine.high %v1959_v47, %v3272_v0  ;;  %v1911_v17 = vcombine.high %v1907_v40, %v3272_v0  ;;  %v1909_v1 = vcombine.high %v1891_v50, %v3272_v0 }
 0x3c5   : > { %2133 = vrot.lane.b32.xlu1 %v1907_v40, %s3275_s19  ;;  %2121 = vrot.lane.b32.xlu0 %v1891_v50, %s3275_s19  ;;  %v1908_v63 = vcombine.high %v3743_v16, %v3272_v0  ;;  %v2111_v2 = vrot.slane %v2097_v54, %v3598_v53  ;;  %v2095_v3 = vrot.slane %v2081_v55, %v3598_v53 }
 0x3c6   : > { %v2043_v4 = vrot.slane %v2029_v15, %v3598_v53  ;;  %v2027_v5 = vrot.slane %v2013_v56, %v3598_v53  ;;  %v3763_v6 = vrot.slane %v2096_v45, %v3598_v53  ;;  %v3766_v7 = vrot.slane %v2080_v38, %v3598_v53 }
 0x3c7   : > { %v3775_v10 = vrot.slane %v2028_v49, %v3598_v53  ;;  %v2115_v18 = vcombine.high %v2111_v2, %v3272_v0  ;;  %v3783_v12 = vrot.slane %v2012_v48, %v3598_v53  ;;  %v2113_v20 = vcombine.high %v2095_v3, %v3272_v0 }
 0x3c8   : > { %v2114_v8 = vcombine.high %v3763_v6, %v3272_v0  ;;  %v2112_v9 = vcombine.high %v3766_v7, %v3272_v0  ;;  %v2047_v19 = vcombine.high %v2043_v4, %v3272_v0  ;;  %v2045_v53 = vcombine.high %v2027_v5, %v3272_v0 }
 0x3c9   : > { %2153 = vrot.lane.b32.xlu1 %v1978_v57, %s3273_s7  ;;  %2141 = vrot.lane.b32.xlu0 %v1976_v58, %s3273_s7  ;;  %v2046_v11 = vcombine.high %v3775_v10, %v3272_v0  ;;  %v2044_v14 = vcombine.high %v3783_v12, %v3272_v0 }
 0x3cd   : > { %2161 = vrot.lane.b32.xlu1 %v1979_v60, %s3274_s17  ;;  %2129 = vrot.lane.b32.xlu0 %v1910_v61, %s3273_s7 }
 0x3d1   : > { %2149 = vrot.lane.b32.xlu1 %v1977_v62, %s3274_s17  ;;  %2117 = vrot.lane.b32.xlu0 %v1908_v63, %s3273_s7 }
 0x3d5   : > { %2137 = vrot.lane.b32.xlu1 %v1911_v17, %s3274_s17  ;;  %2125 = vrot.lane.b32.xlu0 %v1909_v1, %s3274_s17 }
 0x3d9   : > { %2205 = vrot.lane.b32.xlu1 %v2111_v2, %s3275_s19  ;;  %2193 = vrot.lane.b32.xlu0 %v2095_v3, %s3275_s19 }
 0x3dd   : > { %2181 = vrot.lane.b32.xlu1 %v2043_v4, %s3275_s19  ;;  %2169 = vrot.lane.b32.xlu0 %v2027_v5, %s3275_s19 }
 0x3e1   : > { %2201 = vrot.lane.b32.xlu1 %v2114_v8, %s3273_s7  ;;  %2189 = vrot.lane.b32.xlu0 %v2112_v9, %s3273_s7 }
 0x3e5   : > { %2209 = vrot.lane.b32.xlu1 %v2115_v18, %s3274_s17  ;;  %2177 = vrot.lane.b32.xlu0 %v2046_v11, %s3273_s7 }
 0x3e9   : > { %2185 = vrot.lane.b32.xlu1 %v2047_v19, %s3274_s17  ;;  %2165 = vrot.lane.b32.xlu0 %v2044_v14, %s3273_s7  ;;  %s3195_s7 = scalar_lea.vmem %s3862_s27, 1024 }
 0x3ea   : > { %p3196_p8 = scmp.ne.s32.totalorder %s3862_s27, %s3195_s7 }
 0x3ec   : > { %p3197_p1 = pnand %p3196_p8, %p3928_p0 }
 0x3ed   : > { %2197 = vrot.lane.b32.xlu1 %v2113_v20, %s3274_s17  ;;  %2173 = vrot.lane.b32.xlu0 %v2045_v53, %s3274_s17  ;;  %s3279_s17 = smov [#allocation8]  }
 0x3ee   : > { %p3198_p3 = pneg %p3197_p1  ;;  %s3199_s19 = sshll.u32 %s3279_s17, 4  ;;  %s3200_s19 = int_to_ptr.vmem [resolvable:$false] %s3199_s19 }
 0x3ef   : > { %s3201_s12 = scalar_lea.vmem %s3200_s19, 2048  ;;  %p3202_p7 = scmp.lt.s32.totalorder %s3862_s27, %s3200_s19 }
 0x3f0   : > { %p3203_p9 = scmp.lt.s32.totalorder %s3201_s12, %s3195_s7 }
 0x3f1   : > { %2561 = vperm.xlu0 %3104, %v2558_v21  }
 0x3f2   : > { %p3204_p12 = por %p3203_p9, %p3202_p7 }
 0x3f4   : > { %p3205_p2 = pnand %p3204_p12, %p3198_p3 }
 0x433   : > { %v2158_v22 = vpop.permute.xlu1 %2157  ;;  %v2146_v23 = vpop.permute.xlu0 %2145 }
 0x437   : > { %v2134_v24 = vpop.permute.xlu1 %2133  ;;  %v2122_v25 = vpop.permute.xlu0 %2121 }
 0x43b   : > { %v2154_v26 = vpop.permute.xlu1 %2153  ;;  %v2142_v27 = vpop.permute.xlu0 %2141 }
 0x43c   : > { %v2223_v28 = vsel %vm1001_vm2, %v3719_v51, %v2154_v26  ;;  %v2220_v32 = vsel %vm1001_vm2, %v3722_v52, %v2142_v27 }
 0x43d   : > { %v2224_v29 = vsel %vm2213_vm3, %v2223_v28, %v2158_v22  ;;  %v2221_v35 = vsel %vm2213_vm3, %v2220_v32, %v2146_v23 }
 0x43f   : > { %v2162_v30 = vpop.permute.xlu1 %2161  ;;  %v2130_v31 = vpop.permute.xlu0 %2129 }
 0x440   : > { %v2225_v33 = vsel %vm2215_vm4, %v2224_v29, %v2162_v30  ;;  %v2217_v37 = vsel %vm1001_vm2, %v3735_v59, %v2130_v31 }
 0x441   : > { %2764 = vmatprep.subr.msk.mxu1 %vm320_vm0, %v2225_v33  ;;  %v2218_v44 = vsel %vm2213_vm3, %v2217_v37, %v2134_v24 }
 0x443   : > { %v2150_v34 = vpop.permute.xlu1 %2149  ;;  %v2118_v36 = vpop.permute.xlu0 %2117 }
 0x444   : > { %v2222_v41 = vsel %vm2215_vm4, %v2221_v35, %v2150_v34  ;;  %v2212_v42 = vsel %vm1001_vm2, %v3743_v16, %v2118_v36 }
 0x445   : > { %2765 = vmatpush1.msk.msra.mxu1 %vm320_vm0, %v2222_v41  ;;  %v2214_v38 = vsel %vm2213_vm3, %v2212_v42, %v2122_v25 }
 0x446   : > { %2766 = vmatmul.mubr.msk.f32.vlgmr.msra.gmra.mrb[2].mxu1 %vm313_vm1, %v2238_v39 }
 0x447   : > { %v2138_v43 = vpop.permute.xlu1 %2137  ;;  %v2126_v45 = vpop.permute.xlu0 %2125  ;;  %2543 = vmatprep.mubr.f32.mxu1 %v3272_v0 }
 0x448   : > { %v2219_v46 = vsel %vm2215_vm4, %v2218_v44, %v2138_v43  ;;  %v2216_v47 = vsel %vm2215_vm4, %v2214_v38, %v2126_v45 }
 0x449   : > { %2761 = vmatprep.subr.msk.mxu0 %vm320_vm0, %v2219_v46 }
 0x44a   : > { %2762 = vmatpush1.msk.msra.mxu0 %vm320_vm0, %v2216_v47 }
 0x44b   : > { %2763 = vmatmul.mubr.msk.f32.vlgmr.msra.gmra.mrb[2].mxu0 %vm313_vm1, %v2238_v39  ;;  %v2206_v48 = vpop.permute.xlu1 %2205  ;;  %v2194_v49 = vpop.permute.xlu0 %2193 }
 0x44c   : > { %2472 = vmatprep.mubr.f32.mxu0 %v3272_v0 }
 0x44f   : > { %v2182_v40 = vpop.permute.xlu1 %2181  ;;  %v2170_v50 = vpop.permute.xlu0 %2169 }
 0x453   : > { %v2202_v51 = vpop.permute.xlu1 %2201  ;;  %v2190_v52 = vpop.permute.xlu0 %2189 }
 0x454   : > { %v2235_v54 = vsel %vm1001_vm2, %v3763_v6, %v2202_v51  ;;  %v2232_v61 = vsel %vm1001_vm2, %v3766_v7, %v2190_v52 }
 0x455   : > { %v2236_v55 = vsel %vm2213_vm3, %v2235_v54, %v2206_v48  ;;  %v2233_v17 = vsel %vm2213_vm3, %v2232_v61, %v2194_v49 }
 0x457   : > { %v2210_v15 = vpop.permute.xlu1 %2209  ;;  %v2178_v56 = vpop.permute.xlu0 %2177 }
 0x458   : > { %v2237_v57 = vsel %vm2215_vm4, %v2236_v55, %v2210_v15  ;;  %v2229_v58 = vsel %vm1001_vm2, %v3775_v10, %v2178_v56 }
 0x459   : > { %2770 = vmatprep.subr.msk.mxu1 %vm320_vm0, %v2237_v57  ;;  %v2230_v0 = vsel %vm2213_vm3, %v2229_v58, %v2182_v40 }
 0x45b   : > { %v2186_v59 = vpop.permute.xlu1 %2185  ;;  %v2166_v60 = vpop.permute.xlu0 %2165 }
 0x45c   : > { %v2231_v16 = vsel %vm2215_vm4, %v2230_v0, %v2186_v59  ;;  %v2226_v62 = vsel %vm1001_vm2, %v3783_v12, %v2166_v60 }
 0x45d   : > { %2767 = vmatprep.subr.msk.mxu0 %vm320_vm0, %v2231_v16  ;;  %v2227_v1 = vsel %vm2213_vm3, %v2226_v62, %v2170_v50 }
 0x45f   : > { %v2198_v63 = vpop.permute.xlu1 %2197  ;;  %v2174_v2 = vpop.permute.xlu0 %2173 }
 0x460   : > { %v2234_v3 = vsel %vm2215_vm4, %v2233_v17, %v2198_v63  ;;  %v2228_v4 = vsel %vm2215_vm4, %v2227_v1, %v2174_v2 }
 0x461   : > { %2768 = vmatpush1.msk.msra.mxu0 %vm320_vm0, %v2228_v4  ;;  %2771 = vmatpush1.msk.msra.mxu1 %vm320_vm0, %v2234_v3 }
 0x462   : > { %2769 = vmatmul.mubr.msk.f32.vlgmr.msra.gmra.mrb[6].mxu0 %vm313_vm1, %v2238_v39  ;;  %2772 = vmatmul.mubr.msk.f32.vlgmr.msra.gmra.mrb[6].mxu1 %vm313_vm1, %v2238_v39 }
 0x470   : > { %v2562_v5 = vpop.permute.xlu0 %2561 }
 0x519   : > { %v2403_v6 = vpop.f32.mrb[2].mxu1 }
 0x51a   : > { %v2566_v7 = vadd.f32 %v2562_v5, %v2403_v6  ;;  %v2405_v8 = vpop.f32.mrb[3].mxu1 }
 0x51b   : > { %v2567_v9 = vadd.f32 %v2562_v5, %v2405_v8 }
 0x51c   : > { %v2574_v10 = vmul.f32 0.2, %v2566_v7 }
 0x51d   : > { %v2575_v18 = vmul.f32 0.2, %v2567_v9 }
 0x51e   : > { %v2582_v11 = vmax.f32 %v2566_v7, %v2574_v10  ;;  %v2332_v12 = vpop.f32.mrb[2].mxu0 }
 0x51f   : > { %v2583_v13 = vmax.f32 %v2567_v9, %v2575_v18  ;;  %v2564_v19 = vadd.f32 %v2562_v5, %v2332_v12  ;;  %v2334_v14 = vpop.f32.mrb[3].mxu0 }
 0x520   : > { %2590 = vst [vmem:[%s3849_s13 + $0x10] sm:$0xff] %v2582_v11  ;;  %v2565_v20 = vadd.f32 %v2562_v5, %v2334_v14 }
 0x521   : > { %2591 = vst [vmem:[%s3849_s13 + $0x18] sm:$0xff] %v2583_v13  ;;  %v2572_v53 = vmul.f32 0.2, %v2564_v19 }
 0x522   : > { %v2573_v21 = vmul.f32 0.2, %v2565_v20 }
 0x523   : > { %v2580_v22 = vmax.f32 %v2564_v19, %v2572_v53 }
 0x524   : > { %v2581_v23 = vmax.f32 %v2565_v20, %v2573_v21 }
 0x525   : > { %2588 = vst [vmem:[%s3849_s13] sm:$0xff] %v2580_v22 }
 0x526   : > { %2589 = vst [vmem:[%s3849_s13 + $0x8] sm:$0xff] %v2581_v23 }
 0x535   : > { %v2474_v24 = vpop.f32.mrb[6].mxu0  ;;  %v2545_v25 = vpop.f32.mrb[6].mxu1 }
 0x536   : > { %v2568_v26 = vadd.f32 %v2562_v5, %v2474_v24  ;;  %v2570_v27 = vadd.f32 %v2562_v5, %v2545_v25  ;;  %v2476_v28 = vpop.f32.mrb[7].mxu0  ;;  %v2547_v29 = vpop.f32.mrb[7].mxu1 }
 0x537   : > { %v2569_v30 = vadd.f32 %v2562_v5, %v2476_v28  ;;  %v2571_v31 = vadd.f32 %v2562_v5, %v2547_v29 }
 0x538   : > { %v2576_v32 = vmul.f32 0.2, %v2568_v26  ;;  %v2578_v33 = vmul.f32 0.2, %v2570_v27 }
 0x539   : > { %v2577_v34 = vmul.f32 0.2, %v2569_v30  ;;  %v2579_v35 = vmul.f32 0.2, %v2571_v31 }
 0x53a   : > { %v2584_v36 = vmax.f32 %v2568_v26, %v2576_v32  ;;  %v2586_v39 = vmax.f32 %v2570_v27, %v2578_v33 }
 0x53b   : > { %v2585_v37 = vmax.f32 %v2569_v30, %v2577_v34  ;;  %v2587_v41 = vmax.f32 %v2571_v31, %v2579_v35 }
 0x53c   : > { %2592 = vst [vmem:[%s3849_s13 + $0x20] sm:$0xff] %v2584_v36  ;;  %2594 = vst [vmem:[%s3849_s13 + $0x30] sm:$0xff] %v2586_v39 }
 0x53d   : > { %2593 = vst [vmem:[%s3849_s13 + $0x28] sm:$0xff] %v2585_v37  ;;  %2595 = vst [vmem:[%s3849_s13 + $0x38] sm:$0xff] %v2587_v41 }
 0x53e   : > { %3208 = shalt.err (!%p3205_p2)
}
 0x53f   : > { %s3209_s18 = scalar_lea.hbm %s3860_s16, 1024  ;;  %s3213_s8 = scalar_lea.hbm %s3914_s6, 2048 }
 0x540   : > { %p3210_p13 = scmp.ne.s32.totalorder %s3860_s16, %s3209_s18  ;;  %p3214_p4 = scmp.lt.u32.totalorder %s3860_s16, %s3914_s6 }
 0x541   : > { %p3215_p5 = scmp.lt.u32.totalorder %s3213_s8, %s3209_s18  ;;  %p3217_p8 = scmp.lt.u32.totalorder %s3209_s18, %s3860_s16 }
 0x542   : > { %p3211_p6 = pnand %p3210_p13, %p3928_p0 }
 0x543   : > { %p3216_p11 = por %p3215_p5, %p3214_p4 }
 0x544   : > { %p3212_p10 = pneg %p3211_p6 }
 0x545   : > { %p3218_p1 = por %p3217_p8, %p3216_p11 }
 0x547   : > { %p3219_p3 = pnand %p3218_p1, %p3212_p10 }
 0x549   : > { %3222 = shalt.err (!%p3219_p3)
}
 0x54a   : > { %3038 = dma.vmem_to_hbm [thread:$0]  (%p3928_p0), %s3862_s27, 1024, %s3860_s16, %s2597_s25  }
 0x54b PF: > { %s2623_s10 = sand.u32 1, %s3253_s21   ;;  %p3929_p7 = scmp.ne.s32.totalorder %s3919_s28, 0 }
 0x54c   : > { %p3930_p9 = scmp.ge.s32.totalorder %s3265_s24, 2  ;;  %s2624_s29 = scalar_lea.sflag [#allocation4], %s2623_s10 }
 0x54e   : > { %p3052_p12 = pnand %p3930_p9, %p3929_p7 }
 0x550   : > { %3248 = dma.done.wait (!%p3052_p12), %s2624_s29, 1024  }
 0x551   : > { %3250 = vsyncadd (!%p3052_p12), %s2624_s29, 4294966272  ;;  %p20_p2 = scmp.ge.s32.totalorder %s3425_s26, 4   ;;  %s3931_s21 = smov %s3257_s22 }
 0x552   : > { %s3932_s22 = smov %s3261_s23  ;;  %s3933_s23 = smov %s3441_s11 }
 0x553   : > { %s3934_s24 = smov %s3425_s26  ;;  %22 = sbr.rel (!%p20_p2) target bundleno = 6 (0x6), region = 103 }
 0x55a   :  { %2629 = vsyncpa [#allocation3], 1 }
 0x55b   :  { %2631 = vsyncpa [#allocation3 + $0x1], 1 }
 0x55c   :  { %2632 = vsyncpa [#allocation6], 1 }
 0x55d   :  { %2633 = vsyncpa [#allocation4], 1 }
 0x55e   :  { %2635 = vsyncpa [#allocation4 + $0x1], 1 }

</bundles_post_ra>
